<compile_context>
chip_gen: v6e
topology: v6e:2x2x1
jax: 0.10.0
libtpu: 0.0.40
codegen_flags: <defaults>
</compile_context>

<pallas_src>
import jax
import jax.numpy as jnp
from jax.experimental import pallas as pl
from jax.experimental.pallas import tpu as pltpu

D_IN = 100          # logical feature width (torch Linear(100, 100))
D_PAD = 128         # lane-dense padded feature width used internally
MAX_TILE_B = 4096   # max batch tile (rows per grid step), multiple of 16


def _mlp_kernel(x_ref,
                w1_ref, b1_ref,
                w2_ref, b2_ref,
                w3_ref, b3_ref,
                w4_ref, b4_ref,
                o_ref,
                xpad_ref):
    """Fused 4x (Linear + ReLU). x/W in bf16 on the MXU, bias + ReLU in f32."""
    # Pad the (tile_b, 100) f32 input block to a lane-dense (tile_b, 128) bf16
    # tile entirely in VMEM (no padded copy ever touches HBM).
    xpad_ref[...] = jnp.zeros_like(xpad_ref)
    xpad_ref[:, :D_IN] = x_ref[...].astype(jnp.bfloat16)
    h = xpad_ref[...]                                   # (tile_b, 128) bf16

    def linear_relu(h_bf16, w_ref, b_ref):
        y = jnp.dot(h_bf16, w_ref[...],
                    preferred_element_type=jnp.float32)  # MXU, f32 accumulate
        y = y + b_ref[...]                               # (1,128) f32 broadcast
        return jnp.maximum(y, 0.0)                       # ReLU in f32

    h = linear_relu(h, w1_ref, b1_ref)                          # fate_model.layer1
    h = linear_relu(h.astype(jnp.bfloat16), w2_ref, b2_ref)     # fate_model.layer2
    h = linear_relu(h.astype(jnp.bfloat16), w3_ref, b3_ref)     # layer1
    h = linear_relu(h.astype(jnp.bfloat16), w4_ref, b4_ref)     # layer2

    # Only the 100 real lanes are written back (padded lanes never reach HBM).
    o_ref[...] = h[:, :D_IN].astype(o_ref.dtype)


def _round_up(x, m):
    return (x + m - 1) // m * m


def prepare_params(params):
    """Pad/cast the 4 (W, b) pairs ONCE (outside the per-forward hot path).

    W: (100,100) f32 stored [in, out]  ->  (128,128) bf16, zero padded.
    b: (1,100)  f32                    ->  (1,128)  f32,  zero padded.
    Zero padded weight rows guarantee the padded lanes never leak into the
    real 100 output lanes.
    """
    padded = []
    for (w, b) in params:
        w = jnp.asarray(w, jnp.float32)
        b = jnp.asarray(b, jnp.float32).reshape(1, -1)
        w_p = jnp.zeros((D_PAD, D_PAD), jnp.bfloat16).at[
            :w.shape[0], :w.shape[1]].set(w.astype(jnp.bfloat16))
        b_p = jnp.zeros((1, D_PAD), jnp.float32).at[:, :b.shape[1]].set(b)
        padded.append((w_p, b_p))
    return padded


def complex_model_forward(x, padded_params, out_dtype=jnp.float32):
    """x: (B, 100) float32.  padded_params: output of prepare_params()."""
    B, D = x.shape
    assert D == D_IN and len(padded_params) == 4

    # Tile selection: big tiles (amortize ~0.35us per-grid-step overhead) but
    # at least 2 tiles when there is enough work so both v7x TensorCores are
    # used (harmless on v5e/v6e single-TC parts).  Tiles rounded to 16 rows
    # for clean bf16 (16,128) vreg packing.
    n_tiles = max(pl.cdiv(B, MAX_TILE_B), 1)
    if n_tiles == 1 and B > 256:
        n_tiles = 2
    tile_b = _round_up(pl.cdiv(B, n_tiles), 16)
    b_pad = n_tiles * tile_b

    # Row-only padding, and only when B doesn't already divide evenly.
    x_in = x if b_pad == B else (
        jnp.zeros((b_pad, D_IN), x.dtype).at[:B].set(x))

    flat_args = [x_in]
    in_specs = [pl.BlockSpec((tile_b, D_IN), lambda i: (i, 0))]
    for (w_p, b_p) in padded_params:
        flat_args += [w_p, b_p]
        in_specs += [pl.BlockSpec((D_PAD, D_PAD), lambda i: (0, 0)),   # resident
                     pl.BlockSpec((1, D_PAD), lambda i: (0, 0))]       # resident

    weight_bytes = 4 * (D_PAD * D_PAD * 2 + D_PAD * 4)
    cost = pl.CostEstimate(
        flops=4 * 2 * b_pad * D_PAD * D_PAD,
        transcendentals=0,
        bytes_accessed=b_pad * D_IN * 4                      # x read (f32)
        + b_pad * D_IN * jnp.dtype(out_dtype).itemsize       # out write
        + weight_bytes,
    )

    out_p = pl.pallas_call(
        _mlp_kernel,
        out_shape=jax.ShapeDtypeStruct((b_pad, D_IN), out_dtype),
        grid=(n_tiles,),
        in_specs=in_specs,
        out_specs=pl.BlockSpec((tile_b, D_IN), lambda i: (i, 0)),
        scratch_shapes=[pltpu.VMEM((tile_b, D_PAD), jnp.bfloat16)],
        compiler_params=pltpu.CompilerParams(
            dimension_semantics=("parallel",)),
        cost_estimate=cost,
    )(*flat_args)

    return out_p if b_pad == B else out_p[:B]


def _init_linear_params(key, fan_in, fan_out):
    """PyTorch-style uniform(-1/sqrt(fan_in), 1/sqrt(fan_in)) init.

    Weight stored (in_features, out_features) so the kernel computes x @ W
    directly (equivalent to torch's x @ W_t.T)."""
    kw, kb = jax.random.split(key)
    bound = 1.0 / jnp.sqrt(jnp.float32(fan_in))
    w = jax.random.uniform(kw, (fan_in, fan_out), jnp.float32, -bound, bound)
    b = jax.random.uniform(kb, (1, fan_out), jnp.float32, -bound, bound)
    return w, b


def reference_forward_f32(x, params):
    h = x
    for (w, b) in params:
        h = jnp.maximum(h @ w + b, 0.0)
    return h


def reference_forward_bf16(x, params):
    """Same math as the kernel: bf16 operands, f32 accumulate, f32 bias+ReLU."""
    h = x.astype(jnp.bfloat16)
    out = None
    for (w, b) in params:
        out = jnp.maximum(
            jnp.dot(h, w.astype(jnp.bfloat16),
                    preferred_element_type=jnp.float32) + b, 0.0)
        h = out.astype(jnp.bfloat16)
    return out   # last layer output kept in f32


if __name__ == "__main__":
    key = jax.random.PRNGKey(0)
    k_x, k1, k2, k3, k4 = jax.random.split(key, 5)

    B, D = 8, 100
    x = jax.random.normal(k_x, (B, D), jnp.float32)

    params = [
        _init_linear_params(k1, D, D),   # fate_model.layer1
        _init_linear_params(k2, D, D),   # fate_model.layer2
        _init_linear_params(k3, D, D),   # layer1
        _init_linear_params(k4, D, D),   # layer2
    ]

    # Pad/cast weights ONCE, outside the per-forward path.
    padded_params = prepare_params(params)

    out = complex_model_forward(x, padded_params)
    out = jax.block_until_ready(out)
    assert out.shape == (B, D)

    # Exact-math reference (bf16 operands, f32 accumulate) -> tight tolerance.
    ref_bf16 = reference_forward_bf16(x, params)
    assert jnp.allclose(out, ref_bf16, atol=1e-3, rtol=1e-3), \
        "mismatch vs bf16 reference"

    # Full-f32 reference -> loose tolerance (bf16 operand rounding only).
    # TODO(synk): deliberate bf16-operand / f32-accumulate precision tradeoff
    # vs. the all-f32 PyTorch model.
    ref_f32 = reference_forward_f32(x, params)
    assert jnp.allclose(out, ref_f32, atol=5e-2, rtol=5e-2), \
        "mismatch vs f32 reference"

    print("KERNEL_OK")
</pallas_src>

<mosaic_0001>
module attributes {stable_mosaic.version = 11 : i64} {
  func.func @_mlp_kernel(%arg0: i32, %arg1: memref<16x100xf32, #tpu.memory_space<vmem>>, %arg2: memref<128x128xbf16, #tpu.memory_space<vmem>>, %arg3: memref<1x128xf32, #tpu.memory_space<vmem>>, %arg4: memref<128x128xbf16, #tpu.memory_space<vmem>>, %arg5: memref<1x128xf32, #tpu.memory_space<vmem>>, %arg6: memref<128x128xbf16, #tpu.memory_space<vmem>>, %arg7: memref<1x128xf32, #tpu.memory_space<vmem>>, %arg8: memref<128x128xbf16, #tpu.memory_space<vmem>>, %arg9: memref<1x128xf32, #tpu.memory_space<vmem>>, %arg10: memref<16x100xf32, #tpu.memory_space<vmem>>, %arg11: memref<16x128xbf16, #tpu.memory_space<vmem>>) attributes {dimension_semantics = [#tpu.dimension_semantics<parallel>], iteration_bounds = array<i64: 1>, scalar_prefetch = 0 : i64, scratch_operands = 1 : i64, tpu.core_type = #tpu.core_type<tc>, window_params = [{transform_indices = @transform_0, window_bounds = array<i64: 16, 100>}, {pipeline_mode = #tpu.pipeline_mode<synchronous>, transform_indices = @transform_1, window_bounds = array<i64: 128, 128>}, {pipeline_mode = #tpu.pipeline_mode<synchronous>, transform_indices = @transform_2, window_bounds = array<i64: 1, 128>}, {pipeline_mode = #tpu.pipeline_mode<synchronous>, transform_indices = @transform_3, window_bounds = array<i64: 128, 128>}, {pipeline_mode = #tpu.pipeline_mode<synchronous>, transform_indices = @transform_4, window_bounds = array<i64: 1, 128>}, {pipeline_mode = #tpu.pipeline_mode<synchronous>, transform_indices = @transform_5, window_bounds = array<i64: 128, 128>}, {pipeline_mode = #tpu.pipeline_mode<synchronous>, transform_indices = @transform_6, window_bounds = array<i64: 1, 128>}, {pipeline_mode = #tpu.pipeline_mode<synchronous>, transform_indices = @transform_7, window_bounds = array<i64: 128, 128>}, {pipeline_mode = #tpu.pipeline_mode<synchronous>, transform_indices = @transform_8, window_bounds = array<i64: 1, 128>}, {transform_indices = @transform_9, window_bounds = array<i64: 16, 100>}]} {
    %cst = arith.constant 0.000000e+00 : bf16
    %0 = vector.broadcast %cst : bf16 to vector<16x128xbf16>
    %c0 = arith.constant 0 : index
    %c0_0 = arith.constant 0 : index
    %1 = vector.load %arg11[%c0, %c0_0] : memref<16x128xbf16, #tpu.memory_space<vmem>>, vector<16x128xbf16>
    tpu.vector_store %arg11[%c0, %c0_0], %0 {strides = array<i32>} : memref<16x128xbf16, #tpu.memory_space<vmem>>, vector<16x128xbf16>,
    %c0_1 = arith.constant 0 : index
    %c0_2 = arith.constant 0 : index
    %2 = vector.load %arg1[%c0_1, %c0_2] : memref<16x100xf32, #tpu.memory_space<vmem>>, vector<16x100xf32>
    %3 = arith.truncf %2 : vector<16x100xf32> to vector<16x100xbf16>
    %c0_3 = arith.constant 0 : index
    %c0_4 = arith.constant 0 : index
    %4 = vector.load %arg11[%c0_3, %c0_4] : memref<16x128xbf16, #tpu.memory_space<vmem>>, vector<16x100xbf16>
    tpu.vector_store %arg11[%c0_3, %c0_4], %3 {strides = array<i32>} : memref<16x128xbf16, #tpu.memory_space<vmem>>, vector<16x100xbf16>,
    %c0_5 = arith.constant 0 : index
    %c0_6 = arith.constant 0 : index
    %5 = vector.load %arg11[%c0_5, %c0_6] : memref<16x128xbf16, #tpu.memory_space<vmem>>, vector<16x128xbf16>
    %c0_7 = arith.constant 0 : index
    %c0_8 = arith.constant 0 : index
    %6 = vector.load %arg2[%c0_7, %c0_8] : memref<128x128xbf16, #tpu.memory_space<vmem>>, vector<128x128xbf16>
    %cst_9 = arith.constant dense<0.000000e+00> : vector<16x128xf32>
    %7 = tpu.matmul %5, %6, %cst_9 {dimension_numbers = #tpu.dot_dimension_numbers<[1], [0], [0], [1], [0, 0, 1, 1], [], []>} : vector<16x128xbf16>, vector<128x128xbf16>, vector<16x128xf32> -> vector<16x128xf32>
    %c0_10 = arith.constant 0 : index
    %c0_11 = arith.constant 0 : index
    %8 = vector.load %arg3[%c0_10, %c0_11] : memref<1x128xf32, #tpu.memory_space<vmem>>, vector<1x128xf32>
    %9 = vector.broadcast %8 : vector<1x128xf32> to vector<16x128xf32>
    %10 = arith.addf %7, %9 : vector<16x128xf32>
    %cst_12 = arith.constant 0.000000e+00 : f32
    %11 = vector.broadcast %cst_12 : f32 to vector<16x128xf32>
    %12 = arith.maximumf %10, %11 : vector<16x128xf32>
    %13 = arith.truncf %12 : vector<16x128xf32> to vector<16x128xbf16>
    %c0_13 = arith.constant 0 : index
    %c0_14 = arith.constant 0 : index
    %14 = vector.load %arg4[%c0_13, %c0_14] : memref<128x128xbf16, #tpu.memory_space<vmem>>, vector<128x128xbf16>
    %cst_15 = arith.constant dense<0.000000e+00> : vector<16x128xf32>
    %15 = tpu.matmul %13, %14, %cst_15 {dimension_numbers = #tpu.dot_dimension_numbers<[1], [0], [0], [1], [0, 0, 1, 1], [], []>} : vector<16x128xbf16>, vector<128x128xbf16>, vector<16x128xf32> -> vector<16x128xf32>
    %c0_16 = arith.constant 0 : index
    %c0_17 = arith.constant 0 : index
    %16 = vector.load %arg5[%c0_16, %c0_17] : memref<1x128xf32, #tpu.memory_space<vmem>>, vector<1x128xf32>
    %17 = vector.broadcast %16 : vector<1x128xf32> to vector<16x128xf32>
    %18 = arith.addf %15, %17 : vector<16x128xf32>
    %cst_18 = arith.constant 0.000000e+00 : f32
    %19 = vector.broadcast %cst_18 : f32 to vector<16x128xf32>
    %20 = arith.maximumf %18, %19 : vector<16x128xf32>
    %21 = arith.truncf %20 : vector<16x128xf32> to vector<16x128xbf16>
    %c0_19 = arith.constant 0 : index
    %c0_20 = arith.constant 0 : index
    %22 = vector.load %arg6[%c0_19, %c0_20] : memref<128x128xbf16, #tpu.memory_space<vmem>>, vector<128x128xbf16>
    %cst_21 = arith.constant dense<0.000000e+00> : vector<16x128xf32>
    %23 = tpu.matmul %21, %22, %cst_21 {dimension_numbers = #tpu.dot_dimension_numbers<[1], [0], [0], [1], [0, 0, 1, 1], [], []>} : vector<16x128xbf16>, vector<128x128xbf16>, vector<16x128xf32> -> vector<16x128xf32>
    %c0_22 = arith.constant 0 : index
    %c0_23 = arith.constant 0 : index
    %24 = vector.load %arg7[%c0_22, %c0_23] : memref<1x128xf32, #tpu.memory_space<vmem>>, vector<1x128xf32>
    %25 = vector.broadcast %24 : vector<1x128xf32> to vector<16x128xf32>
    %26 = arith.addf %23, %25 : vector<16x128xf32>
    %cst_24 = arith.constant 0.000000e+00 : f32
    %27 = vector.broadcast %cst_24 : f32 to vector<16x128xf32>
    %28 = arith.maximumf %26, %27 : vector<16x128xf32>
    %29 = arith.truncf %28 : vector<16x128xf32> to vector<16x128xbf16>
    %c0_25 = arith.constant 0 : index
    %c0_26 = arith.constant 0 : index
    %30 = vector.load %arg8[%c0_25, %c0_26] : memref<128x128xbf16, #tpu.memory_space<vmem>>, vector<128x128xbf16>
    %cst_27 = arith.constant dense<0.000000e+00> : vector<16x128xf32>
    %31 = tpu.matmul %29, %30, %cst_27 {dimension_numbers = #tpu.dot_dimension_numbers<[1], [0], [0], [1], [0, 0, 1, 1], [], []>} : vector<16x128xbf16>, vector<128x128xbf16>, vector<16x128xf32> -> vector<16x128xf32>
    %c0_28 = arith.constant 0 : index
    %c0_29 = arith.constant 0 : index
    %32 = vector.load %arg9[%c0_28, %c0_29] : memref<1x128xf32, #tpu.memory_space<vmem>>, vector<1x128xf32>
    %33 = vector.broadcast %32 : vector<1x128xf32> to vector<16x128xf32>
    %34 = arith.addf %31, %33 : vector<16x128xf32>
    %cst_30 = arith.constant 0.000000e+00 : f32
    %35 = vector.broadcast %cst_30 : f32 to vector<16x128xf32>
    %36 = arith.maximumf %34, %35 : vector<16x128xf32>
    %37 = vector.extract_strided_slice %36 {offsets = [0, 0], sizes = [16, 100], strides = [1, 1]} : vector<16x128xf32> to vector<16x100xf32>
    %c0_31 = arith.constant 0 : index
    %c0_32 = arith.constant 0 : index
    %38 = vector.load %arg10[%c0_31, %c0_32] : memref<16x100xf32, #tpu.memory_space<vmem>>, vector<16x100xf32>
    tpu.vector_store %arg10[%c0_31, %c0_32], %37 {strides = array<i32>} : memref<16x100xf32, #tpu.memory_space<vmem>>, vector<16x100xf32>,
    return
  }
  func.func @transform_0(%arg0: i32) -> (i32, i32) {
    %c0_i32 = arith.constant 0 : i32
    %c0_i32_0 = arith.constant 0 : i32
    return %arg0, %c0_i32 : i32, i32
  }
  func.func @transform_1(%arg0: i32) -> (i32, i32) {
    %c0_i32 = arith.constant 0 : i32
    %c0_i32_0 = arith.constant 0 : i32
    %c0_i32_1 = arith.constant 0 : i32
    return %c0_i32, %c0_i32_0 : i32, i32
  }
  func.func @transform_2(%arg0: i32) -> (i32, i32) {
    %c0_i32 = arith.constant 0 : i32
    %c0_i32_0 = arith.constant 0 : i32
    %c0_i32_1 = arith.constant 0 : i32
    return %c0_i32, %c0_i32_0 : i32, i32
  }
  func.func @transform_3(%arg0: i32) -> (i32, i32) {
    %c0_i32 = arith.constant 0 : i32
    %c0_i32_0 = arith.constant 0 : i32
    %c0_i32_1 = arith.constant 0 : i32
    return %c0_i32, %c0_i32_0 : i32, i32
  }
  func.func @transform_4(%arg0: i32) -> (i32, i32) {
    %c0_i32 = arith.constant 0 : i32
    %c0_i32_0 = arith.constant 0 : i32
    %c0_i32_1 = arith.constant 0 : i32
    return %c0_i32, %c0_i32_0 : i32, i32
  }
  func.func @transform_5(%arg0: i32) -> (i32, i32) {
    %c0_i32 = arith.constant 0 : i32
    %c0_i32_0 = arith.constant 0 : i32
    %c0_i32_1 = arith.constant 0 : i32
    return %c0_i32, %c0_i32_0 : i32, i32
  }
  func.func @transform_6(%arg0: i32) -> (i32, i32) {
    %c0_i32 = arith.constant 0 : i32
    %c0_i32_0 = arith.constant 0 : i32
    %c0_i32_1 = arith.constant 0 : i32
    return %c0_i32, %c0_i32_0 : i32, i32
  }
  func.func @transform_7(%arg0: i32) -> (i32, i32) {
    %c0_i32 = arith.constant 0 : i32
    %c0_i32_0 = arith.constant 0 : i32
    %c0_i32_1 = arith.constant 0 : i32
    return %c0_i32, %c0_i32_0 : i32, i32
  }
  func.func @transform_8(%arg0: i32) -> (i32, i32) {
    %c0_i32 = arith.constant 0 : i32
    %c0_i32_0 = arith.constant 0 : i32
    %c0_i32_1 = arith.constant 0 : i32
    return %c0_i32, %c0_i32_0 : i32, i32
  }
  func.func @transform_9(%arg0: i32) -> (i32, i32) {
    %c0_i32 = arith.constant 0 : i32
    %c0_i32_0 = arith.constant 0 : i32
    return %arg0, %c0_i32 : i32, i32
  }
}

</mosaic_0001>

<bundles_post_ra>
// kernel: tpu_custom_call.1
= control target key start
LH: loop header
LB: loop body
LE: loop exit
PB: predicated region body
PF: predicated region fallthrough
CT: control target
= control target key end

     0   :  { %14 = vsyncpa [#allocation4], 0  ;;  %s1088_s0 = inlined_call_operand.hbm [shape: f32[16,100], index: 0, kind: input, shape index: {}]   ;;  %s1089_s1 = inlined_call_operand.hbm [shape: bf16[128,128], index: 1, kind: input, shape index: {}]   ;;  %s1090_s2 = inlined_call_operand.vmem [shape: f32[1,128], index: 2, kind: input, shape index: {}]   ;;  %s1091_s3 = inlined_call_operand.hbm [shape: bf16[128,128], index: 3, kind: input, shape index: {}]   ;;  %s1092_s4 = inlined_call_operand.vmem [shape: f32[1,128], index: 4, kind: input, shape index: {}]   ;;  %s1093_s5 = inlined_call_operand.hbm [shape: bf16[128,128], index: 5, kind: input, shape index: {}]   ;;  %s1094_s6 = inlined_call_operand.vmem [shape: f32[1,128], index: 6, kind: input, shape index: {}]   ;;  %s1095_s7 = inlined_call_operand.hbm [shape: bf16[128,128], index: 7, kind: input, shape index: {}]   ;;  %s1096_s8 = inlined_call_operand.vmem [shape: f32[1,128], index: 8, kind: input, shape index: {}]   ;;  %s1097_s9 = inlined_call_operand.hbm [shape: f32[16,100], index: 9, kind: output, shape index: {}]  }
   0x1   :  { %15 = vsyncpa [#allocation7], 0 }
   0x2   :  { %16 = vsyncpa [#allocation10], 0 }
   0x3   :  { %17 = vsyncpa [#allocation5], 0  ;;  %s937_s30 = smov [#allocation6]  }
   0x4   :  { %s35_s10 = sshll.u32 %s937_s30, 4  ;;  %s36_s10 = int_to_ptr.vmem [resolvable:$true] %s35_s10 }
   0x5   :  { %s817_s11 = scalar_lea.vmem %s36_s10, 1024  ;;  %p822_p1 = scmp.lt.s32.totalorder %s36_s10, %s36_s10 }
   0x6   :  { %p818_p0 = scmp.ne.s32.totalorder %s36_s10, %s817_s11  ;;  %p823_p2 = scmp.lt.s32.totalorder %s817_s11, %s817_s11 }
   0x8   :  { %p824_p3 = por %p823_p2, %p822_p1 }
   0xa   :  { %p825_p4 = pnand %p824_p3, %p818_p0 }
   0xc   :  { %828 = shalt.err (!%p825_p4)
}
   0xd   :  { %s938_s12 = smov 64   ;;  %s939_s13 = smov 4  }
   0xe   :  { %41 = dma.hbm_to_vmem [thread:$0]  %s1089_s1, 1024, %s36_s10, [#allocation7], %s938_s12, %s938_s12, %s939_s13  }
   0xf   :  { %s940_s16 = smov [#allocation9]   ;;  %s941_s18 = smov [#allocation3]  }
  0x10   :  { %s63_s17 = sshll.u32 %s940_s16, 4  ;;  %s23_s19 = sshll.u32 %s941_s18, 4  ;;  %s64_s17 = int_to_ptr.vmem [resolvable:$true] %s63_s17  ;;  %s24_s19 = int_to_ptr.vmem [resolvable:$true] %s23_s19 }
  0x11   :  { %s837_s20 = scalar_lea.vmem %s64_s17, 1024  ;;  %p842_p6 = scmp.lt.s32.totalorder %s64_s17, %s64_s17 }
  0x12   :  { %p838_p5 = scmp.ne.s32.totalorder %s64_s17, %s837_s20  ;;  %p843_p7 = scmp.lt.s32.totalorder %s837_s20, %s837_s20 }
  0x14   :  { %p844_p8 = por %p843_p7, %p842_p6 }
  0x16   :  { %p845_p9 = pnand %p844_p8, %p838_p5 }
  0x18   :  { %848 = shalt.err (!%p845_p9)
}
  0x19   :  { %69 = dma.hbm_to_vmem [thread:$0]  %s1093_s5, 1024, %s64_s17, [#allocation10], %s938_s12, %s938_s12, %s939_s13  }
  0x1a   :  { %s857_s1 = scalar_lea.vmem %s24_s19, 256  ;;  %p862_p11 = scmp.lt.s32.totalorder %s24_s19, %s24_s19 }
  0x1b   :  { %p858_p10 = scmp.ne.s32.totalorder %s24_s19, %s857_s1  ;;  %p863_p12 = scmp.lt.s32.totalorder %s857_s1, %s857_s1 }
  0x1d   :  { %p864_p13 = por %p863_p12, %p862_p11 }
  0x1f   :  { %p865_p0 = pnand %p864_p13, %p858_p10 }
  0x21   :  { %868 = shalt.err (!%p865_p0)
}
  0x22   :  { %s942_s23 = smov 128   ;;  %s943_s24 = smov 8  }
  0x23   :  { %29 = dma.hbm_to_vmem [thread:$0]  %s1088_s0, 256, %s24_s19, [#allocation4], %s942_s23, %s942_s23, %s943_s24  }
  0x24   :  { %s944_s27 = smov [#allocation8]   ;;  %s945_s5 = smov [#allocation11]  }
  0x25   :  { %s49_s28 = sshll.u32 %s944_s27, 4  ;;  %s77_s29 = sshll.u32 %s945_s5, 4  ;;  %s50_s28 = int_to_ptr.vmem [resolvable:$true] %s49_s28  ;;  %s78_s29 = int_to_ptr.vmem [resolvable:$true] %s77_s29 }
  0x26   :  { %s877_s30 = scalar_lea.vmem %s50_s28, 1024  ;;  %p882_p2 = scmp.lt.s32.totalorder %s50_s28, %s50_s28 }
  0x27   :  { %p878_p1 = scmp.ne.s32.totalorder %s50_s28, %s877_s30  ;;  %p883_p3 = scmp.lt.s32.totalorder %s877_s30, %s877_s30 }
  0x29   :  { %p884_p4 = por %p883_p3, %p882_p2 }
  0x2b   :  { %p885_p5 = pnand %p884_p4, %p878_p1 }
  0x2d   :  { %888 = shalt.err (!%p885_p5)
}
  0x2e   :  { %55 = dma.hbm_to_vmem [thread:$0]  %s1091_s3, 1024, %s50_s28, [#allocation7], %s938_s12, %s938_s12, %s939_s13  }
  0x2f   :  { %s897_s0 = scalar_lea.vmem %s78_s29, 1024  ;;  %p902_p7 = scmp.lt.s32.totalorder %s78_s29, %s78_s29 }
  0x30   :  { %p898_p6 = scmp.ne.s32.totalorder %s78_s29, %s897_s0  ;;  %p903_p8 = scmp.lt.s32.totalorder %s897_s0, %s897_s0 }
  0x32   :  { %p904_p9 = por %p903_p8, %p902_p7 }
  0x34   :  { %p905_p10 = pnand %p904_p9, %p898_p6 }
  0x36   :  { %908 = shalt.err (!%p905_p10)
}
  0x37   :  { %83 = dma.hbm_to_vmem [thread:$0]  %s1095_s7, 1024, %s78_s29, [#allocation10], %s938_s12, %s938_s12, %s939_s13  }
  0x38   :  { %929 = dma.done.wait [#allocation4], 256  }
  0x39   :  { %930 = vsyncadd [#allocation4], 4294967040 }
  0x3a   :  { %931 = dma.done.wait [#allocation7], 2048  }
  0x3b   :  { %932 = vsyncadd [#allocation7], 4294965248 }
  0x3c   :  { %933 = dma.done.wait [#allocation10], 2048  }
  0x3d   :  { %934 = vsyncadd [#allocation10], 4294965248  ;;  %v946_v0 = vmov 0.0   ;;  %vm947_vm0 = vmmov 0   ;;  %v948_v1 = vmov 0   ;;  %v776_v2 = vld [vmem:[#allocation6 + $0x38] sm:$0xff]  }
  0x3e   :  { %683 = vmatprep.subr.bf16.mxu0 %v946_v0  ;;  %699 = vmatprep.mubr.msk.bf16.mxu0 %vm947_vm0, %v946_v0  ;;  %102 = vst [vmem:[#allocation2] sm:$0xf] %v948_v1  ;;  %103 = vst [vmem:[#allocation2 + $0x4] sm:$0xf] %v948_v1  ;;  %v777_v3 = vld [vmem:[#allocation6 + $0x30] sm:$0xff]   ;;  %v778_v4 = vld [vmem:[#allocation6 + $0x28] sm:$0xff]  }
  0x3f   :  { %703 = vmatprep.subr.bf16.mxu1 %v946_v0  ;;  %719 = vmatprep.mubr.msk.bf16.mxu1 %vm947_vm0, %v946_v0  ;;  %v104_v5 = vld [vmem:[#allocation3] sm:$0xff]  ;;  %v105_v6 = vld [vmem:[#allocation3 + $0x8] sm:$0xff]  ;;  %vm114_vm1 = vcmask 814080   ;;  %v779_v10 = vld [vmem:[#allocation6 + $0x20] sm:$0xff]   ;;  %vm584_vm2 = vcmask 818176  }
  0x40   :  { %684 = vmatpush3.bf16.msra.mxu0 %v776_v2  ;;  %v645_v7 = vpack.c.bf16 %v104_v5, %v104_v5  ;;  %v646_v8 = vpack.c.bf16 %v105_v6, %v105_v6  ;;  %v785_v9 = vld [vmem:[#allocation8 + $0x38] sm:$0xff]   ;;  %v786_v11 = vld [vmem:[#allocation8 + $0x30] sm:$0xff]   ;;  %v787_v13 = vld [vmem:[#allocation8 + $0x28] sm:$0xff]  }
  0x41   :  { %685 = vmatprep.subr.bf16.mxu0 %v946_v0  ;;  %704 = vmatpush3.bf16.msra.mxu1 %v785_v9  ;;  %v780_v12 = vld [vmem:[#allocation6 + $0x18] sm:$0xff]   ;;  %v781_v14 = vld [vmem:[#allocation6 + $0x10] sm:$0xff]   ;;  %v788_v15 = vld [vmem:[#allocation8 + $0x20] sm:$0xff]  }
  0x42   :  { %115 = vst.msk [vmem:[#allocation2] sm:$0xf] %vm114_vm1, %v645_v7  ;;  %116 = vst.msk [vmem:[#allocation2 + $0x4] sm:$0xf] %vm114_vm1, %v646_v8  ;;  %705 = vmatprep.subr.bf16.mxu1 %v946_v0  ;;  %v782_v16 = vld [vmem:[#allocation6 + $0x8] sm:$0xff]   ;;  %v789_v17 = vld [vmem:[#allocation8 + $0x18] sm:$0xff]  }
  0x43   :  { %v783_v18 = vld [vmem:[#allocation6] sm:$0xff]   ;;  %v790_v20 = vld [vmem:[#allocation8 + $0x10] sm:$0xff]   ;;  %v791_v21 = vld [vmem:[#allocation8 + $0x8] sm:$0xff]  }
  0x44   :  { %686 = vmatpush3.bf16.msra.mxu0 %v777_v3  ;;  %v792_v22 = vld [vmem:[#allocation8] sm:$0xff]   ;;  %v793_v23 = vld [vmem:[#allocation9 + $0x38] sm:$0xff]   ;;  %v794_v24 = vld [vmem:[#allocation9 + $0x30] sm:$0xff]  }
  0x45   :  { %687 = vmatprep.subr.bf16.mxu0 %v946_v0  ;;  %706 = vmatpush3.bf16.msra.mxu1 %v786_v11  ;;  %v795_v25 = vld [vmem:[#allocation9 + $0x28] sm:$0xff]   ;;  %v796_v26 = vld [vmem:[#allocation9 + $0x20] sm:$0xff]   ;;  %v797_v27 = vld [vmem:[#allocation9 + $0x18] sm:$0xff]  }
  0x46   :  { %707 = vmatprep.subr.bf16.mxu1 %v946_v0  ;;  %v608_v28 = vld [vmem:[%s1090_s2] ss:$0 sm:$0xff]  ;;  %v798_v38 = vld [vmem:[#allocation9 + $0x10] sm:$0xff]   ;;  %v800_v40 = vld [vmem:[#allocation9] sm:$0xff]  }
  0x47   :  { %v799_v39 = vld [vmem:[#allocation9 + $0x8] sm:$0xff]   ;;  %v801_v41 = vld [vmem:[#allocation11 + $0x38] sm:$0xff]   ;;  %v802_v42 = vld [vmem:[#allocation11 + $0x30] sm:$0xff]  }
  0x48   :  { %688 = vmatpush3.bf16.msra.mxu0 %v778_v4  ;;  %v803_v43 = vld [vmem:[#allocation11 + $0x28] sm:$0xff]   ;;  %v804_v44 = vld [vmem:[#allocation11 + $0x20] sm:$0xff]   ;;  %v805_v45 = vld [vmem:[#allocation11 + $0x18] sm:$0xff]  }
  0x49   :  { %689 = vmatprep.subr.bf16.mxu0 %v946_v0  ;;  %708 = vmatpush3.bf16.msra.mxu1 %v787_v13  ;;  %v784_v19 = vld [vmem:[#allocation2] sm:$0xff]   ;;  %v806_v56 = vld [vmem:[#allocation11 + $0x10] sm:$0xff]   ;;  %v808_v58 = vld [vmem:[#allocation11] sm:$0xff]  }
  0x4a   :  { %709 = vmatprep.subr.bf16.mxu1 %v946_v0  ;;  %v618_v46 = vld [vmem:[%s1092_s4] ss:$0 sm:$0xff] }
  0x4b   :  { %v807_v57 = vld [vmem:[#allocation11 + $0x8] sm:$0xff]  }
  0x4c   :  { %690 = vmatpush3.bf16.msra.mxu0 %v779_v10  ;;  %v627_v59 = vld [vmem:[%s1094_s6] ss:$0 sm:$0xff]  ;;  %s949_s6 = smov [#allocation12]  }
  0x4d   :  { %691 = vmatprep.subr.bf16.mxu0 %v946_v0  ;;  %710 = vmatpush3.bf16.msra.mxu1 %v788_v15  ;;  %s592_s18 = sshll.u32 %s949_s6, 4  ;;  %s593_s18 = int_to_ptr.vmem [resolvable:$true] %s592_s18 }
  0x4e   :  { %711 = vmatprep.subr.bf16.mxu1 %v946_v0  ;;  %s909_s19 = scalar_lea.vmem %s593_s18, 256  ;;  %p914_p12 = scmp.lt.s32.totalorder %s593_s18, %s593_s18 }
  0x4f   :  { %p910_p11 = scmp.ne.s32.totalorder %s593_s18, %s909_s19  ;;  %p915_p13 = scmp.lt.s32.totalorder %s909_s19, %s909_s19 }
  0x50   :  { %692 = vmatpush3.bf16.msra.mxu0 %v780_v12 }
  0x51   :  { %693 = vmatprep.subr.bf16.mxu0 %v946_v0  ;;  %712 = vmatpush3.bf16.msra.mxu1 %v789_v17  ;;  %p916_p0 = por %p915_p13, %p914_p12 }
  0x52   :  { %713 = vmatprep.subr.bf16.mxu1 %v946_v0 }
  0x53   :  { %p917_p1 = pnand %p916_p0, %p910_p11 }
  0x54   :  { %694 = vmatpush3.bf16.msra.mxu0 %v781_v14 }
  0x55   :  { %695 = vmatprep.subr.bf16.mxu0 %v946_v0  ;;  %714 = vmatpush3.bf16.msra.mxu1 %v790_v20 }
  0x56   :  { %715 = vmatprep.subr.bf16.mxu1 %v946_v0 }
  0x58   :  { %696 = vmatpush3.bf16.msra.mxu0 %v782_v16 }
  0x59   :  { %697 = vmatprep.subr.bf16.mxu0 %v946_v0  ;;  %716 = vmatpush3.bf16.msra.mxu1 %v791_v21 }
  0x5a   :  { %717 = vmatprep.subr.bf16.mxu1 %v946_v0 }
  0x5c   :  { %698 = vmatpush3.bf16.msra.mxu0 %v783_v18 }
  0x5d   :  { %723 = vmatprep.subr.bf16.mxu0 %v946_v0  ;;  %718 = vmatpush3.bf16.msra.mxu1 %v792_v22 }
  0x5e   :  { %743 = vmatprep.subr.bf16.mxu1 %v946_v0 }
  0x5f   :  { %700 = vmatmul.mubr.bf16.vlgmr.msra.gmra.mxu0 %v784_v19 }
  0x60   :  { %739 = vmatprep.mubr.msk.bf16.mxu0 %vm947_vm0, %v946_v0  ;;  %724 = vmatpush3.bf16.msra.mxu0 %v793_v23 }
  0x61   :  { %725 = vmatprep.subr.bf16.mxu0 %v946_v0 }
  0x64   :  { %726 = vmatpush3.bf16.msra.mxu0 %v794_v24 }
  0x65   :  { %727 = vmatprep.subr.bf16.mxu0 %v946_v0 }
  0x68   :  { %728 = vmatpush3.bf16.msra.mxu0 %v795_v25 }
  0x69   :  { %729 = vmatprep.subr.bf16.mxu0 %v946_v0 }
  0x6c   :  { %730 = vmatpush3.bf16.msra.mxu0 %v796_v26 }
  0x6d   :  { %731 = vmatprep.subr.bf16.mxu0 %v946_v0 }
  0x70   :  { %732 = vmatpush3.bf16.msra.mxu0 %v797_v27 }
  0x71   :  { %733 = vmatprep.subr.bf16.mxu0 %v946_v0 }
  0x74   :  { %734 = vmatpush3.bf16.msra.mxu0 %v798_v38 }
  0x75   :  { %735 = vmatprep.subr.bf16.mxu0 %v946_v0 }
  0x78   :  { %736 = vmatpush3.bf16.msra.mxu0 %v799_v39 }
  0x79   :  { %737 = vmatprep.subr.bf16.mxu0 %v946_v0 }
  0x7c   :  { %738 = vmatpush3.bf16.msra.mxu0 %v800_v40 }
 0x11f   :  { %v230_v29 = vpop.f32.mrf.mxu0 }
 0x120   :  { %v231_v31 = vadd.f32 %v608_v28, %v230_v29 }
 0x121   :  { %v701_v30 = vpop.f32.mrf.mxu0 }
 0x122   :  { %v237_v35 = vmax.f32 %v231_v31, 0.0 }
 0x123   :  { %v233_v32 = vpop.f32.mrf.mxu0 }
 0x124   :  { %v234_v33 = vadd.f32 %v608_v28, %v233_v32 }
 0x125   :  { %v702_v34 = vpop.f32.mrf.mxu0 }
 0x126   :  { %v238_v36 = vmax.f32 %v234_v33, 0.0 }
 0x128   :  { %v239_v37 = vpack.c.bf16 %v238_v36, %v237_v35 }
 0x12a   :  { %720 = vmatmul.mubr.bf16.vlgmr.msra.gmra.mxu1 %v239_v37 }
 0x12b   :  { %759 = vmatprep.mubr.msk.bf16.mxu1 %vm947_vm0, %v946_v0  ;;  %744 = vmatpush3.bf16.msra.mxu1 %v801_v41 }
 0x12c   :  { %745 = vmatprep.subr.bf16.mxu1 %v946_v0 }
 0x12f   :  { %746 = vmatpush3.bf16.msra.mxu1 %v802_v42 }
 0x130   :  { %747 = vmatprep.subr.bf16.mxu1 %v946_v0 }
 0x133   :  { %748 = vmatpush3.bf16.msra.mxu1 %v803_v43 }
 0x134   :  { %749 = vmatprep.subr.bf16.mxu1 %v946_v0 }
 0x137   :  { %750 = vmatpush3.bf16.msra.mxu1 %v804_v44 }
 0x138   :  { %751 = vmatprep.subr.bf16.mxu1 %v946_v0 }
 0x13b   :  { %752 = vmatpush3.bf16.msra.mxu1 %v805_v45 }
 0x13c   :  { %753 = vmatprep.subr.bf16.mxu1 %v946_v0 }
 0x13f   :  { %754 = vmatpush3.bf16.msra.mxu1 %v806_v56 }
 0x140   :  { %755 = vmatprep.subr.bf16.mxu1 %v946_v0 }
 0x143   :  { %756 = vmatpush3.bf16.msra.mxu1 %v807_v57 }
 0x144   :  { %757 = vmatprep.subr.bf16.mxu1 %v946_v0  ;;  %v636_v0 = vld [vmem:[%s1096_s8] ss:$0 sm:$0xff] }
 0x147   :  { %758 = vmatpush3.bf16.msra.mxu1 %v808_v58 }
 0x1ea   :  { %v345_v47 = vpop.f32.mrf.mxu1 }
 0x1eb   :  { %v346_v49 = vadd.f32 %v618_v46, %v345_v47 }
 0x1ec   :  { %v721_v48 = vpop.f32.mrf.mxu1 }
 0x1ed   :  { %v352_v53 = vmax.f32 %v346_v49, 0.0 }
 0x1ee   :  { %v348_v50 = vpop.f32.mrf.mxu1 }
 0x1ef   :  { %v349_v51 = vadd.f32 %v618_v46, %v348_v50 }
 0x1f0   :  { %v722_v52 = vpop.f32.mrf.mxu1 }
 0x1f1   :  { %v353_v54 = vmax.f32 %v349_v51, 0.0 }
 0x1f3   :  { %v354_v55 = vpack.c.bf16 %v353_v54, %v352_v53 }
 0x1f5   :  { %740 = vmatmul.mubr.bf16.vlgmr.msra.gmra.mxu0 %v354_v55 }
 0x2b5   :  { %v460_v60 = vpop.f32.mrf.mxu0 }
 0x2b6   :  { %v461_v62 = vadd.f32 %v627_v59, %v460_v60 }
 0x2b7   :  { %v741_v61 = vpop.f32.mrf.mxu0 }
 0x2b8   :  { %v467_v3 = vmax.f32 %v461_v62, 0.0 }
 0x2b9   :  { %v463_v63 = vpop.f32.mrf.mxu0 }
 0x2ba   :  { %v464_v1 = vadd.f32 %v627_v59, %v463_v63 }
 0x2bb   :  { %v742_v2 = vpop.f32.mrf.mxu0 }
 0x2bc   :  { %v468_v4 = vmax.f32 %v464_v1, 0.0 }
 0x2be   :  { %v469_v5 = vpack.c.bf16 %v468_v4, %v467_v3 }
 0x2c0   :  { %760 = vmatmul.mubr.bf16.vlgmr.msra.gmra.mxu1 %v469_v5 }
 0x380   :  { %v575_v6 = vpop.f32.mrf.mxu1 }
 0x381   :  { %v576_v7 = vadd.f32 %v636_v0, %v575_v6 }
 0x382   :  { %v761_v8 = vpop.f32.mrf.mxu1 }
 0x383   :  { %v582_v9 = vmax.f32 %v576_v7, 0.0 }
 0x384   :  { %v578_v10 = vpop.f32.mrf.mxu1 }
 0x385   :  { %v579_v11 = vadd.f32 %v636_v0, %v578_v10  ;;  %585 = vst.msk [vmem:[#allocation12] sm:$0xff] %vm584_vm2, %v582_v9 }
 0x386   :  { %v762_v12 = vpop.f32.mrf.mxu1 }
 0x387   :  { %v583_v13 = vmax.f32 %v579_v11, 0.0 }
 0x389   :  { %586 = vst.msk [vmem:[#allocation12 + $0x8] sm:$0xff] %vm584_vm2, %v583_v13 }
 0x38a   :  { %920 = shalt.err (!%p917_p1)
}
 0x38b   :  { %598 = dma.vmem_to_hbm [thread:$0]  %s593_s18, 256, %s1097_s9, [#allocation5], %s942_s23, %s942_s23, %s943_s24  }
 0x38c   :  { %935 = dma.done.wait [#allocation5], 256  }
 0x38d   :  { %936 = vsyncadd [#allocation5], 4294967040 }
 0x38e   :  { %602 = vsyncpa [#allocation4], 1 }
 0x38f   :  { %603 = vsyncpa [#allocation7], 1 }
 0x390   :  { %604 = vsyncpa [#allocation10], 1 }
 0x391   :  { %605 = vsyncpa [#allocation5], 1 }

</bundles_post_ra>
